<compile_context>
chip_gen: v7x
topology: tpu7x:2x2x1
jax: 0.10.0
libtpu: 0.0.40
codegen_flags: <defaults>
</compile_context>

<pallas_src>
import functools
import math

import jax
import jax.numpy as jnp
from jax import lax
from jax.experimental import pallas as pl
from jax.experimental.pallas import tpu as pltpu


def fixed_angles_kernel(x_ref, w0_ref, p_ref, o_ref, *, act):
    # x_ref:  (TB, d)  bf16   batch tile
    # w0_ref: (h, d)   bf16   resident unit-row weights
    # p_ref:  (3, h)   f32    [r/sqrt(d), bias*B, W/h]
    # o_ref:  (1, TB)  f32    lane-dense output tile (batch on lanes)

    # Single MXU pass: x (TB,d) . W0 (h,d), contracting d -> (TB, h), f32 acc.
    dot = lax.dot_general(
        x_ref[...], w0_ref[...],
        dimension_numbers=(((1,), (1,)), ((), ())),
        preferred_element_type=jnp.float32)

    p = p_ref[...]
    scale = p[0:1, :]      # r / sqrt(d)   -- scaling the matmul output is
    offset = p[1:2, :]     # bias * B         mathematically identical to
    vout = p[2:3, :]       # W / h            scaling the weight rows.

    pre = dot * scale + offset          # (TB, h), VPU epilogue in f32
    a = act(pre)

    # Readout contracting h: (1, h) x (TB, h) -> (1, TB).  Lane-dense store.
    o_ref[...] = lax.dot_general(
        vout, a,
        dimension_numbers=(((1,), (1,)), ((), ())),
        preferred_element_type=jnp.float32)


def make_fixed_angles(r, W0, B, W, bias, act=jax.nn.relu, block_b=128):
    """One-time parameter prep (mirrors FixedAngles.__init__) + forward fn.

    r: (h, 1) or (h,); W0: (h, d) unit rows; B, W: (h,); bias: python scalar.
    Returns forward(x) with x: (batch, d) -> (batch,) f32.
    """
    h, d = W0.shape
    inv_sqrt_d = 1.0 / math.sqrt(d)

    # Packed parameter glue, computed once (NOT per forward call).
    params = jnp.stack(
        [
            (jnp.reshape(r, (h,)) * inv_sqrt_d).astype(jnp.float32),
            (bias * jnp.reshape(B, (h,))).astype(jnp.float32),
            (jnp.reshape(W, (h,)) / h).astype(jnp.float32),
        ],
        axis=0)                                   # (3, h)
    w0_bf16 = W0.astype(jnp.bfloat16)             # halves W0 DMA traffic

    kernel = functools.partial(fixed_angles_kernel, act=act)

    def forward(x):
        batch = x.shape[0]
        n_b = pl.cdiv(batch, block_b)
        batch_pad = n_b * block_b

        x_p = x.astype(jnp.bfloat16)
        if batch_pad != batch:
            x_p = jnp.pad(x_p, ((0, batch_pad - batch), (0, 0)))

        # VMEM budget: double-buffered x/out tiles + resident W0/params + headroom.
        vmem_need = 2 * (block_b * d * 2 + block_b * 4
                         + h * d * 2 + 3 * h * 4) + (2 << 20)
        vmem_limit = int(min(max(vmem_need, 32 << 20), 48 << 20))

        out = pl.pallas_call(
            kernel,
            out_shape=jax.ShapeDtypeStruct((1, batch_pad), jnp.float32),
            grid=(n_b,),
            in_specs=[
                pl.BlockSpec((block_b, d), lambda i: (i, 0)),  # batch-tiled x
                pl.BlockSpec((h, d), lambda i: (0, 0)),        # resident W0
                pl.BlockSpec((3, h), lambda i: (0, 0)),        # resident params
            ],
            out_specs=pl.BlockSpec((1, block_b), lambda i: (0, i)),
            compiler_params=pltpu.CompilerParams(
                dimension_semantics=("parallel",),
                vmem_limit_bytes=vmem_limit),
        )(x_p, w0_bf16, params)

        return out[0, :batch]                     # (batch,) f32

    return forward


def fixed_angles_ref(x, r, W0, B, W, bias, act=jax.nn.relu):
    d = x.shape[1]
    h = W0.shape[0]
    pre = x @ ((jnp.reshape(r, (h, 1)) * W0).T / math.sqrt(d)) + bias * jnp.reshape(B, (h,))
    return act(pre) @ (W / h)


if __name__ == "__main__":
    batch, d, h = 16, 32, 64
    bias = 0.7

    key = jax.random.PRNGKey(0)
    k_w0, k_w, k_b, k_x = jax.random.split(key, 4)

    # Deterministic parameter init (mirrors FixedAngles.__init__), with a
    # nonzero B so the bias*B path is actually exercised.
    W0_raw = jax.random.normal(k_w0, (h, d), dtype=jnp.float32)
    r = jnp.linalg.norm(W0_raw, axis=1, keepdims=True)           # (h, 1)
    W0 = W0_raw / r                                              # unit rows
    B = 0.1 * jax.random.normal(k_b, (h,), dtype=jnp.float32)
    W = jax.random.normal(k_w, (h,), dtype=jnp.float32)

    x = jax.random.normal(k_x, (batch, d), dtype=jnp.float32)

    forward = make_fixed_angles(r, W0, B, W, bias, act=jax.nn.relu)
    out = jax.block_until_ready(forward(x))

    ref = fixed_angles_ref(x, r, W0, B, W, bias, act=jax.nn.relu)
    assert out.shape == (batch,)
    # Tolerance deliberately relaxed for bf16 MXU inputs (f32 accumulation).
    assert jnp.allclose(out, ref, atol=1e-2, rtol=1e-2), (out, ref)

    print("KERNEL_OK")
</pallas_src>

<mosaic_0001>
module attributes {stable_mosaic.version = 11 : i64} {
  func.func @fixed_angles_kernel(%arg0: i32, %arg1: memref<128x32xbf16, #tpu.memory_space<vmem>>, %arg2: memref<64x32xbf16, #tpu.memory_space<vmem>>, %arg3: memref<3x64xf32, #tpu.memory_space<vmem>>, %arg4: memref<1x128xf32, #tpu.memory_space<vmem>>) attributes {dimension_semantics = [#tpu.dimension_semantics<parallel>], iteration_bounds = array<i64: 1>, scalar_prefetch = 0 : i64, scratch_operands = 0 : i64, tpu.core_type = #tpu.core_type<tc>, window_params = [{transform_indices = @transform_0, window_bounds = array<i64: 128, 32>}, {pipeline_mode = #tpu.pipeline_mode<synchronous>, transform_indices = @transform_1, window_bounds = array<i64: 64, 32>}, {pipeline_mode = #tpu.pipeline_mode<synchronous>, transform_indices = @transform_2, window_bounds = array<i64: 3, 64>}, {transform_indices = @transform_3, window_bounds = array<i64: 1, 128>}]} {
    %c0 = arith.constant 0 : index
    %c0_0 = arith.constant 0 : index
    %0 = vector.load %arg1[%c0, %c0_0] : memref<128x32xbf16, #tpu.memory_space<vmem>>, vector<128x32xbf16>
    %c0_1 = arith.constant 0 : index
    %c0_2 = arith.constant 0 : index
    %1 = vector.load %arg2[%c0_1, %c0_2] : memref<64x32xbf16, #tpu.memory_space<vmem>>, vector<64x32xbf16>
    %cst = arith.constant dense<0.000000e+00> : vector<128x64xf32>
    %2 = tpu.matmul %0, %1, %cst {dimension_numbers = #tpu.dot_dimension_numbers<[1], [1], [0], [0], [0, 0, 1, 0], [], []>} : vector<128x32xbf16>, vector<64x32xbf16>, vector<128x64xf32> -> vector<128x64xf32>
    %c0_3 = arith.constant 0 : index
    %c0_4 = arith.constant 0 : index
    %3 = vector.load %arg3[%c0_3, %c0_4] : memref<3x64xf32, #tpu.memory_space<vmem>>, vector<3x64xf32>
    %4 = vector.extract_strided_slice %3 {offsets = [0, 0], sizes = [1, 64], strides = [1, 1]} : vector<3x64xf32> to vector<1x64xf32>
    %5 = vector.extract_strided_slice %3 {offsets = [1, 0], sizes = [1, 64], strides = [1, 1]} : vector<3x64xf32> to vector<1x64xf32>
    %6 = vector.extract_strided_slice %3 {offsets = [2, 0], sizes = [1, 64], strides = [1, 1]} : vector<3x64xf32> to vector<1x64xf32>
    %7 = vector.broadcast %4 : vector<1x64xf32> to vector<128x64xf32>
    %8 = arith.mulf %2, %7 : vector<128x64xf32>
    %9 = vector.broadcast %5 : vector<1x64xf32> to vector<128x64xf32>
    %10 = arith.addf %8, %9 : vector<128x64xf32>
    %cst_5 = arith.constant 0.000000e+00 : f32
    %11 = vector.broadcast %cst_5 : f32 to vector<128x64xf32>
    %12 = arith.maximumf %10, %11 : vector<128x64xf32>
    %cst_6 = arith.constant dense<0.000000e+00> : vector<1x128xf32>
    %13 = tpu.matmul %6, %12, %cst_6 {dimension_numbers = #tpu.dot_dimension_numbers<[1], [1], [0], [0], [0, 0, 1, 0], [], []>} : vector<1x64xf32>, vector<128x64xf32>, vector<1x128xf32> -> vector<1x128xf32>
    %c0_7 = arith.constant 0 : index
    %c0_8 = arith.constant 0 : index
    %14 = vector.load %arg4[%c0_7, %c0_8] : memref<1x128xf32, #tpu.memory_space<vmem>>, vector<1x128xf32>
    tpu.vector_store %arg4[%c0_7, %c0_8], %13 {strides = array<i32>} : memref<1x128xf32, #tpu.memory_space<vmem>>, vector<1x128xf32>,
    return
  }
  func.func @transform_0(%arg0: i32) -> (i32, i32) {
    %c0_i32 = arith.constant 0 : i32
    %c0_i32_0 = arith.constant 0 : i32
    return %arg0, %c0_i32 : i32, i32
  }
  func.func @transform_1(%arg0: i32) -> (i32, i32) {
    %c0_i32 = arith.constant 0 : i32
    %c0_i32_0 = arith.constant 0 : i32
    %c0_i32_1 = arith.constant 0 : i32
    return %c0_i32, %c0_i32_0 : i32, i32
  }
  func.func @transform_2(%arg0: i32) -> (i32, i32) {
    %c0_i32 = arith.constant 0 : i32
    %c0_i32_0 = arith.constant 0 : i32
    %c0_i32_1 = arith.constant 0 : i32
    return %c0_i32, %c0_i32_0 : i32, i32
  }
  func.func @transform_3(%arg0: i32) -> (i32, i32) {
    %c0_i32 = arith.constant 0 : i32
    %c0_i32_0 = arith.constant 0 : i32
    return %c0_i32, %arg0 : i32, i32
  }
}

</mosaic_0001>

<bundles_post_ra>
// kernel: tpu_custom_call.1
= control target key start
LH: loop header
LB: loop body
LE: loop exit
PB: predicated region body
PF: predicated region fallthrough
CT: control target
= control target key end

     0   :  { %vm100_vm0 = vcmask 261120   ;;  %s793_s0 = inlined_call_operand.vmem [shape: bf16[128,32], index: 0, kind: input, shape index: {}]   ;;  %s794_s1 = inlined_call_operand.vmem [shape: bf16[64,32], index: 1, kind: input, shape index: {}]   ;;  %s795_s2 = inlined_call_operand.vmem [shape: f32[3,64], index: 2, kind: input, shape index: {}]   ;;  %s796_s3 = inlined_call_operand.hbm [shape: f32[1,128], index: 3, kind: output, shape index: {}]  }
   0x1   :  { %v594_v0 = vld [vmem:[%s794_s1] sm:$0xff]   ;;  %v595_v1 = vld [vmem:[%s794_s1 + $0x8] sm:$0xff]   ;;  %v596_v5 = vld [vmem:[%s794_s1 + $0x10] sm:$0xff]  }
   0x2   :  { %586 = vmatprep.subr.msk.bf16.mxu0 %vm100_vm0, %v594_v0  ;;  %v126_v2 = vsel %vm100_vm0, %v594_v0, 0  ;;  %v598_v3 = vld [vmem:[%s793_s0] sm:$0xff]   ;;  %v129_v4 = vsel %vm100_vm0, %v595_v1, 0 }
   0x3   :  { %496 = vmatpush3.bf16.xpose.msra.mxu0 %v126_v2  ;;  %503 = vmatprep.mubr.msk.bf16.mxu0 %vm100_vm0, %v598_v3 }
   0x4   :  { %587 = vmatprep.subr.msk.bf16.mxu0 %vm100_vm0, %v595_v1 }
   0xb   :  { %498 = vmatpush3.bf16.xpose.msra.mxu0 %v129_v4 }
   0xc   :  { %588 = vmatprep.subr.msk.bf16.mxu0 %vm100_vm0, %v596_v5 }
   0xd   :  { %8 = vsyncpa [#allocation3], 0  ;;  %v132_v6 = vsel %vm100_vm0, %v596_v5, 0  ;;  %v597_v7 = vld [vmem:[%s794_s1 + $0x18] sm:$0xff]   ;;  %v599_v9 = vld [vmem:[%s793_s0 + $0x8] sm:$0xff]   ;;  %v630_v16 = vmov 0.0|0.0   ;;  %v235_v18 = vlaneseq }
   0xe   :  { %v135_v8 = vsel %vm100_vm0, %v597_v7, 0  ;;  %v600_v10 = vld [vmem:[%s793_s0 + $0x10] sm:$0xff]   ;;  %v601_v11 = vld [vmem:[%s793_s0 + $0x18] sm:$0xff]   ;;  %v602_v12 = vld [vmem:[%s793_s0 + $0x20] sm:$0xff]   ;;  %554 = vmatprep.subr.bf16.mxu1 %v630_v16  ;;  %vm631_vm1 = vmmov 0   ;;  %v632_v17 = vmov 0.0  }
   0xf   :  { %v603_v13 = vld [vmem:[%s793_s0 + $0x28] sm:$0xff]   ;;  %v604_v14 = vld [vmem:[%s793_s0 + $0x30] sm:$0xff]   ;;  %v605_v15 = vld [vmem:[%s793_s0 + $0x38] sm:$0xff]   ;;  %551 = vmatprep.mubr.msk.f32.mxu1 %vm631_vm1, %v632_v17  ;;  %v236_v19 = vshrl.u32 %v235_v18, 7  ;;  %vm293_vm2 = vcmask 523264   ;;  %s633_s0 = smov [#allocation2]  }
  0x10   :  { %v710_v21 = vld [vmem:[%s795_s2] sm:$0x7]  ;;  %vm728_vm3 = vmpackc.low %vm293_vm2, %vm293_vm2  ;;  %s421_s2 = sshll.u32 %s633_s0, 4  ;;  %s422_s2 = int_to_ptr.vmem [resolvable:$true] %s421_s2 }
  0x11   :  { %v237_v20 = vsub.s32 0, %v236_v19  ;;  %v257_v22 = vsub.s32 1, %v236_v19  ;;  %s606_s10 = scalar_lea.vmem %s422_s2, 16  ;;  %s610_s11 = scalar_lea.vmem %s422_s2, 32 }
  0x12   :  { %p607_p0 = scmp.ne.s32.totalorder %s422_s2, %s606_s10  ;;  %p611_p1 = scmp.lt.s32.totalorder %s422_s2, %s422_s2 }
  0x13   :  { %500 = vmatpush3.bf16.xpose.msra.mxu0 %v132_v6  ;;  %v713_v23 = vrot.slane %v710_v21, %v237_v20  ;;  %v716_v24 = vrot.slane %v710_v21, %v257_v22  ;;  %p612_p2 = scmp.lt.s32.totalorder %s610_s11, %s606_s10 }
  0x14   :  { %589 = vmatprep.subr.msk.bf16.mxu0 %vm100_vm0, %v597_v7 }
  0x15   :  { %p613_p3 = por %p612_p2, %p611_p1 }
  0x17   :  { %p614_p4 = pnand %p613_p3, %p607_p0 }
  0x1b   :  { %502 = vmatpush3.bf16.xpose.msra.mxu0 %v135_v8 }
  0x22   :  { %504 = vmatmul.mubr.msk.bf16.vlgmr.msra.gmra.mrb[0].mxu0 %vm100_vm0, %v599_v9 }
  0x23   :  { %507 = vmatprep.mubr.msk.bf16.mxu0 %vm100_vm0, %v600_v10 }
  0x2a   :  { %508 = vmatmul.mubr.msk.bf16.gmra.mrb[4].mxu0 %vm100_vm0, %v601_v11 }
  0x2b   :  { %511 = vmatprep.mubr.msk.bf16.mxu0 %vm100_vm0, %v602_v12 }
  0x32   :  { %512 = vmatmul.mubr.msk.bf16.gmra.mrb[8].mxu0 %vm100_vm0, %v603_v13 }
  0x33   :  { %515 = vmatprep.mubr.msk.bf16.mxu0 %vm100_vm0, %v604_v14 }
  0x3a   :  { %516 = vmatmul.mubr.msk.bf16.gmra.mrb[12].mxu0 %vm100_vm0, %v605_v15 }
  0xf5   :  { %v505_v25 = vpop.f32.mrb[0].mxu0 }
  0xf6   :  { %v241_v26 = vmul.f32 %v505_v25, %v713_v23  ;;  %v171_v27 = vpop.f32.mrb[1].mxu0 }
  0xf7   :  { %v239_v28 = vmul.f32 %v713_v23, %v171_v27  ;;  %v506_v29 = vpop.f32.mrb[2].mxu0 }
  0xf8   :  { %v261_v30 = vadd.f32 %v716_v24, %v241_v26  ;;  %v242_v31 = vmul.f32 %v506_v29, %v713_v23  ;;  %v174_v32 = vpop.f32.mrb[3].mxu0 }
  0xf9   :  { %v259_v33 = vadd.f32 %v716_v24, %v239_v28  ;;  %v240_v34 = vmul.f32 %v713_v23, %v174_v32 }
  0xfa   :  { %v262_v35 = vadd.f32 %v716_v24, %v242_v31  ;;  %v277_v37 = vmax.f32 %v261_v30, 0.0 }
  0xfb   :  { %v260_v36 = vadd.f32 %v716_v24, %v240_v34  ;;  %v275_v39 = vmax.f32 %v259_v33, 0.0 }
  0xfc   :  { %v278_v38 = vmax.f32 %v262_v35, 0.0 }
  0xfd   :  { %v276_v40 = vmax.f32 %v260_v36, 0.0  ;;  %v509_v41 = vpop.f32.mrb[4].mxu0 }
  0xfe   :  { %v559_v42 = vpack.c.bf16 %v278_v38, %v277_v37  ;;  %v245_v44 = vmul.f32 %v509_v41, %v713_v23  ;;  %v187_v45 = vpop.f32.mrb[5].mxu0 }
  0xff   :  { %v555_v46 = vpack.c.bf16 %v276_v40, %v275_v39  ;;  %v243_v47 = vmul.f32 %v713_v23, %v187_v45  ;;  %v510_v48 = vpop.f32.mrb[6].mxu0 }
 0x100   :  { %v265_v49 = vadd.f32 %v716_v24, %v245_v44  ;;  %v246_v50 = vmul.f32 %v510_v48, %v713_v23  ;;  %v190_v51 = vpop.f32.mrb[7].mxu0 }
 0x101   :  { %557 = vmatpush3.bf16.xpose.msk.msra.mxu1 %vm728_vm3, %v555_v46  ;;  %v263_v52 = vadd.f32 %v716_v24, %v243_v47  ;;  %v244_v53 = vmul.f32 %v713_v23, %v190_v51 }
 0x102   :  { %v281_v54 = vmax.f32 %v265_v49, 0.0  ;;  %v266_v55 = vadd.f32 %v716_v24, %v246_v50  ;;  %558 = vmatprep.subr.bf16.mxu1 %v630_v16 }
 0x103   :  { %v279_v56 = vmax.f32 %v263_v52, 0.0  ;;  %v264_v57 = vadd.f32 %v716_v24, %v244_v53 }
 0x104   :  { %v282_v58 = vmax.f32 %v266_v55, 0.0 }
 0x105   :  { %v280_v59 = vmax.f32 %v264_v57, 0.0  ;;  %v513_v60 = vpop.f32.mrb[8].mxu0 }
 0x106   :  { %v567_v61 = vpack.c.bf16 %v282_v58, %v281_v54  ;;  %v249_v62 = vmul.f32 %v513_v60, %v713_v23  ;;  %v203_v63 = vpop.f32.mrb[9].mxu0 }
 0x107   :  { %v563_v0 = vpack.c.bf16 %v280_v59, %v279_v56  ;;  %v247_v1 = vmul.f32 %v713_v23, %v203_v63  ;;  %v514_v2 = vpop.f32.mrb[10].mxu0 }
 0x108   :  { %v269_v3 = vadd.f32 %v716_v24, %v249_v62  ;;  %v250_v4 = vmul.f32 %v514_v2, %v713_v23  ;;  %v206_v5 = vpop.f32.mrb[11].mxu0 }
 0x109   :  { %561 = vmatpush3.bf16.xpose.msk.msra.mxu1 %vm728_vm3, %v559_v42  ;;  %v267_v6 = vadd.f32 %v716_v24, %v247_v1  ;;  %v248_v7 = vmul.f32 %v713_v23, %v206_v5 }
 0x10a   :  { %562 = vmatprep.subr.bf16.mxu1 %v630_v16  ;;  %v285_v8 = vmax.f32 %v269_v3, 0.0  ;;  %v270_v9 = vadd.f32 %v716_v24, %v250_v4 }
 0x10b   :  { %v283_v10 = vmax.f32 %v267_v6, 0.0  ;;  %v268_v11 = vadd.f32 %v716_v24, %v248_v7 }
 0x10c   :  { %v286_v12 = vmax.f32 %v270_v9, 0.0 }
 0x10d   :  { %v284_v13 = vmax.f32 %v268_v11, 0.0  ;;  %v517_v14 = vpop.f32.mrb[12].mxu0 }
 0x10e   :  { %v575_v15 = vpack.c.bf16 %v286_v12, %v285_v8  ;;  %v253_v17 = vmul.f32 %v517_v14, %v713_v23  ;;  %v219_v18 = vpop.f32.mrb[13].mxu0 }
 0x10f   :  { %v571_v19 = vpack.c.bf16 %v284_v13, %v283_v10  ;;  %v251_v20 = vmul.f32 %v713_v23, %v219_v18  ;;  %v518_v22 = vpop.f32.mrb[14].mxu0 }
 0x110   :  { %v273_v25 = vadd.f32 %v716_v24, %v253_v17  ;;  %v254_v26 = vmul.f32 %v518_v22, %v713_v23  ;;  %v222_v27 = vpop.f32.mrb[15].mxu0 }
 0x111   :  { %565 = vmatpush3.bf16.xpose.msk.msra.mxu1 %vm728_vm3, %v563_v0  ;;  %v271_v28 = vadd.f32 %v716_v24, %v251_v20  ;;  %v252_v29 = vmul.f32 %v713_v23, %v222_v27  ;;  %v292_v23 = vrot.slane %v710_v21, 2 }
 0x112   :  { %566 = vmatprep.subr.bf16.mxu1 %v630_v16  ;;  %v289_v30 = vmax.f32 %v273_v25, 0.0  ;;  %v274_v31 = vadd.f32 %v716_v24, %v254_v26 }
 0x113   :  { %v287_v32 = vmax.f32 %v271_v28, 0.0  ;;  %v272_v33 = vadd.f32 %v716_v24, %v252_v29 }
 0x114   :  { %v290_v34 = vmax.f32 %v274_v31, 0.0 }
 0x115   :  { %v288_v35 = vmax.f32 %v272_v33, 0.0 }
 0x116   :  { %v583_v36 = vpack.c.bf16 %v290_v34, %v289_v30 }
 0x117   :  { %v579_v37 = vpack.c.bf16 %v288_v35, %v287_v32 }
 0x119   :  { %569 = vmatpush3.bf16.xpose.msk.msra.mxu1 %vm728_vm3, %v567_v61 }
 0x11a   :  { %570 = vmatprep.subr.bf16.mxu1 %v630_v16 }
 0x121   :  { %573 = vmatpush3.bf16.xpose.msk.msra.mxu1 %vm728_vm3, %v571_v19 }
 0x122   :  { %574 = vmatprep.subr.bf16.mxu1 %v630_v16 }
 0x129   :  { %577 = vmatpush3.bf16.xpose.msk.msra.mxu1 %vm728_vm3, %v575_v15 }
 0x12a   :  { %578 = vmatprep.subr.bf16.mxu1 %v630_v16 }
 0x131   :  { %581 = vmatpush3.bf16.xpose.msk.msra.mxu1 %vm728_vm3, %v579_v37 }
 0x132   :  { %582 = vmatprep.subr.bf16.mxu1 %v630_v16 }
 0x139   :  { %585 = vmatpush3.bf16.xpose.msk.msra.mxu1 %vm728_vm3, %v583_v36 }
 0x140   :  { %552 = vmatmul.mubr.msk.f32.vlgmr.msra.gmra.mrb[0].mxu1 %vm293_vm2, %v292_v23 }
 0x213   :  { %v410_v24 = vpop.f32.mrb[0].mxu1 }
 0x214   :  { %414 = vst [vmem:[#allocation2] sm:$0x1] %v410_v24  ;;  %v553_v38 = vpop.f32.mrb[1].mxu1 }
 0x215   :  { %617 = shalt.err (!%p614_p4)
}
 0x216   :  { %s618_s14 = scalar_lea.hbm %s796_s3, 16 }
 0x217   :  { %p619_p5 = scmp.ne.s32.totalorder %s796_s3, %s618_s14  ;;  %p622_p6 = scmp.lt.u32.totalorder %s618_s14, %s796_s3 }
 0x219   :  { %p624_p7 = pnand %p622_p6, %p619_p5 }
 0x21b   :  { %627 = shalt.err (!%p624_p7)
}
 0x21c   :  { %424 = dma.vmem_to_hbm [thread:$0]  %s422_s2, 16, %s796_s3, [#allocation3]  }
 0x21d   :  { %628 = dma.done.wait [#allocation3], 16  }
 0x21e   :  { %629 = vsyncadd [#allocation3], 4294967280 }
 0x21f   :  { %428 = vsyncpa [#allocation3], 1 }

</bundles_post_ra>
